<compile_context>
chip_gen: v6e
topology: v6e:2x2x1
jax: 0.10.0
libtpu: 0.0.40
codegen_flags: <defaults>
</compile_context>

<pallas_src>
import functools

import jax
import jax.numpy as jnp
from jax import lax
from jax.experimental import pallas as pl
from jax.experimental.pallas import tpu as pltpu


def _dw_gn_pw_kernel(xp_ref, wrow_ref, grp_ref, aff_ref, pww_ref, pwb_ref,
                     o_ref, *, H, W, C, KH, KW, pad, eps, inv_n):
    """Fused depthwise 3x3 conv + GroupNorm + 1x1 conv on a lane-packed block.

    xp_ref  : (Bb, H, W*C)     lane-packed input (f32), no halo padding
    wrow_ref: (KH*KW, W*C)     depthwise weights tiled over W; W-boundary
                               columns pre-masked to zero
    grp_ref : (W*C, W*C)       0/1 same-group matrix (aggregate + broadcast)
    aff_ref : (3, W*C)         rows: dw bias / gamma / beta, per lane
    pww_ref : (W*C, W*C_out)   block-diagonal packed 1x1 weights (bf16)
    pwb_ref : (1, W*C_out)     1x1 bias tiled over W
    o_ref   : (Bb, H, W*C_out) bf16 output
    """
    Bb = xp_ref.shape[0]
    L = W * C
    Lout = o_ref.shape[-1]
    BH = Bb * H

    # Merged (Bb*H, L) view: leading-dim merge is a layout no-op and makes both
    # the sublane (kh) rolls and the final 1x1 matmul plain 2-D.
    x2 = xp_ref[...].reshape(BH, L)
    wrow = wrow_ref[...]                                    # (KH*KW, L)

    # Row-within-image index, used to mask the H-halo taps.
    row_in_img = lax.broadcasted_iota(jnp.int32, (Bb, H, L), 1).reshape(BH, L)

    # ---- depthwise KHxKW conv (bias folded later); lane/sublane rolls -------
    acc = None
    for kh in range(KH):
        dh = kh - pad                                       # -1, 0, +1
        if dh == 0:
            xk = x2
        else:
            # Output row h needs input row h+dh: the sublane roll brings it in
            # place; image-boundary rows (and cross-image wrap rows) are zeroed.
            xk = pltpu.roll(x2, (-dh) % BH, axis=0)
            valid = (row_in_img >= -dh) if dh < 0 else (row_in_img < H - dh)
            xk = jnp.where(valid, xk, 0.0)
        for kw in range(KW):
            shift = ((pad - kw) * C) % L
            xs = pltpu.roll(xk, shift, axis=1) if shift else xk
            term = xs * wrow[kh * KW + kw]
            acc = term if acc is None else acc + term       # init from 1st tap

    # ---- GroupNorm statistics (depthwise bias folded analytically) ----------
    b_lane = aff_ref[0]                                     # (L,)
    gamma_l = aff_ref[1]
    beta_l = aff_ref[2]

    acc3 = acc.reshape(Bb, H, L)
    lane_sum = jnp.sum(acc3, axis=1)                        # (Bb, L)
    lane_sq = jnp.sum(acc3 * acc3, axis=1)
    s1 = lane_sum + H * b_lane                              # sums of (a+b)
    s2 = lane_sq + 2.0 * b_lane * lane_sum + H * (b_lane * b_lane)

    # One stacked matmul: per-group sums, already broadcast back per lane.
    stacked = jnp.concatenate([s1, s2], axis=0)             # (2*Bb, L)
    g = jnp.dot(stacked, grp_ref[...],
                preferred_element_type=jnp.float32,
                precision=lax.Precision.HIGHEST) * inv_n
    mean = g[:Bb]                                           # (Bb, L)
    var = jnp.maximum(g[Bb:] - mean * mean, 0.0)            # clamp >= 0
    scale = lax.rsqrt(var + eps) * gamma_l
    shift_v = (b_lane - mean) * scale + beta_l

    # ---- normalize (2 VPU ops/elem) + 1x1 conv as ONE tall MXU matmul -------
    y = acc3 * scale[:, None, :] + shift_v[:, None, :]      # (Bb, H, L) f32
    yb = y.reshape(BH, L).astype(jnp.bfloat16)
    out = jnp.dot(yb, pww_ref[...],
                  preferred_element_type=jnp.float32) + pwb_ref[0]
    o_ref[...] = out.reshape(Bb, H, Lout).astype(o_ref.dtype)


def depthwise_conv2d_forward(x_nchw, params, *, groups=4, eps=1e-5):
    """Pallas implementation of DepthWiseConv2d.forward (NCHW in / NCHW out)."""
    dw_w, dw_b, gamma, beta, pw_w, pw_b = params
    N, C, H, W = x_nchw.shape
    C_out = pw_w.shape[0]
    KH, KW = dw_w.shape[2], dw_w.shape[3]
    pad = (3 + (3 - 1) * (1 - 1)) // 2          # module's padding formula, =1
    L = W * C
    Lout = W * C_out

    assert KH == 3 and KW == 3, "only kernel_size=3 (module default) supported"
    assert C % groups == 0, "GroupNorm(4) requires dim_in % 4 == 0"
    assert L % 128 == 0 and Lout % 128 == 0, (
        "lane-dense packing requires W*C and W*C_out to be multiples of 128")

    # ---- plain-JAX glue: lane-pack only (halo handled inside the kernel) ----
    x_pack = jnp.transpose(x_nchw, (0, 2, 3, 1)).reshape(N, H, L)
    x_pack = x_pack.astype(jnp.float32)   # keep f32 input (bf16 input optional)

    # Depthwise weights tiled over W; W-boundary columns masked to zero so the
    # in-kernel lane rotation needs no W padding and no wrap-around masking.
    col = jnp.arange(W)
    kw_mask = jnp.stack(
        [((col + kw - pad >= 0) & (col + kw - pad < W)) for kw in range(KW)]
    ).astype(jnp.float32)                                        # (KW, W)
    dw_k = jnp.transpose(dw_w[:, 0], (1, 2, 0))                  # (KH, KW, C)
    wrow = (dw_k[:, :, None, :] * kw_mask[None, :, :, None]).reshape(KH * KW, L)

    # Per-lane affine terms (dw bias / gamma / beta).
    aff = jnp.stack([jnp.tile(dw_b, W), jnp.tile(gamma, W),
                     jnp.tile(beta, W)]).astype(jnp.float32)     # (3, L)

    # Same-group 0/1 matrix: one matmul does aggregate + broadcast-back.
    gid = (jnp.arange(L) % C) // (C // groups)
    grpA = (gid[:, None] == gid[None, :]).astype(jnp.float32)    # (L, L)

    # Block-diagonal packed 1x1 weights (bf16) and lane-tiled bias.
    # TODO(synk): for W*C >> 128 switch to a (N*H*W, C)x(C, C_out) formulation;
    # the dense block-diagonal matrix scales as (W*C)^2.
    pw = pw_w[:, :, 0, 0]                                        # (C_out, C)
    wbig = (jnp.eye(W, dtype=jnp.float32)[:, None, :, None]
            * jnp.transpose(pw)[None, :, None, :])               # (W,C,W,C_out)
    wbig = wbig.reshape(L, Lout).astype(jnp.bfloat16)
    pwb_lane = jnp.tile(pw_b, W).reshape(1, Lout).astype(jnp.float32)

    # ---- batch blocking: per-generation VMEM budget, >=2 grid steps ---------
    try:
        vmem_cap = int(pltpu.get_tpu_info().vmem_capacity_bytes)
    except Exception:
        vmem_cap = 64 * 1024 * 1024        # conservative (v7x per-TC VMEM)
    budget = vmem_cap // 3                 # ~43 MiB on v5e/v6e, ~22 MiB on v7x

    f32b, bf16b = 4, 2
    per_img = (2 * H * L * f32b            # double-buffered f32 input block
               + 2 * H * Lout * bf16b      # double-buffered bf16 output block
               + 6 * H * L * f32b          # live f32 temps in the tap/norm path
               + H * Lout * (f32b + bf16b))  # 1x1 f32 accumulator + bf16 acts
    # Constants counted double-buffered (their index_map is constant; marking
    # them pl.Buffered(1) would reclaim this ~0.26 MiB if headroom gets tight).
    const_bytes = 2 * ((KH * KW * L + L * L + 3 * L + Lout) * f32b
                       + L * Lout * bf16b)
    usable = max(budget - const_bytes, per_img)

    Bb = max(1, min(N, usable // per_img))
    if N >= 2:
        min_steps = 8 if N >= 16 else 2    # pipelining; 2nd TensorCore on v7x
        Bb = min(Bb, max(1, N // min_steps))
    Npad = pl.cdiv(N, Bb) * Bb
    if Npad != N:                          # avoid Bb=1 collapse for awkward N
        x_pack = jnp.pad(x_pack, ((0, Npad - N), (0, 0), (0, 0)))

    vmem_limit = int(min(vmem_cap - 8 * 1024 * 1024,
                         max(Bb * per_img + const_bytes + (8 << 20), 32 << 20)))

    kernel = functools.partial(
        _dw_gn_pw_kernel, H=H, W=W, C=C, KH=KH, KW=KW, pad=pad, eps=eps,
        inv_n=1.0 / float(H * W * (C // groups)))

    out_pack = pl.pallas_call(
        kernel,
        out_shape=jax.ShapeDtypeStruct((Npad, H, Lout), jnp.bfloat16),
        grid=(Npad // Bb,),
        in_specs=[
            pl.BlockSpec((Bb, H, L), lambda b: (b, 0, 0)),
            pl.BlockSpec((KH * KW, L), lambda b: (0, 0)),
            pl.BlockSpec((L, L), lambda b: (0, 0)),
            pl.BlockSpec((3, L), lambda b: (0, 0)),
            pl.BlockSpec((L, Lout), lambda b: (0, 0)),
            pl.BlockSpec((1, Lout), lambda b: (0, 0)),
        ],
        out_specs=pl.BlockSpec((Bb, H, Lout), lambda b: (b, 0, 0)),
        compiler_params=pltpu.CompilerParams(
            dimension_semantics=("parallel",),
            vmem_limit_bytes=vmem_limit),
    )(x_pack, wrow, grpA, aff, wbig, pwb_lane)

    if Npad != N:
        out_pack = out_pack[:N]
    out = out_pack.reshape(N, H, W, C_out)
    return jnp.transpose(out, (0, 3, 1, 2)).astype(x_nchw.dtype)   # NCHW, f32


def reference_forward(x, params, *, groups=4, eps=1e-5):
    """Pure-JAX f32 reference matching the PyTorch module semantics."""
    dw_w, dw_b, gamma, beta, pw_w, pw_b = params
    N, C, H, W = x.shape
    y = lax.conv_general_dilated(
        x, dw_w, window_strides=(1, 1), padding=((1, 1), (1, 1)),
        feature_group_count=C, dimension_numbers=("NCHW", "OIHW", "NCHW"))
    y = y + dw_b[None, :, None, None]
    yg = y.reshape(N, groups, C // groups, H, W)
    mean = yg.mean(axis=(2, 3, 4), keepdims=True)
    var = yg.var(axis=(2, 3, 4), keepdims=True)
    yn = ((yg - mean) / jnp.sqrt(var + eps)).reshape(N, C, H, W)
    yn = yn * gamma[None, :, None, None] + beta[None, :, None, None]
    out = jnp.einsum("nchw,oc->nohw", yn, pw_w[:, :, 0, 0])
    return out + pw_b[None, :, None, None]


def init_params(key, dim_in, dim_out, kernel_size=3):
    """Deterministic synthetic parameters with the module's shapes."""
    k1, k2, k3, k4, k5, k6 = jax.random.split(key, 6)
    dw_w = jax.random.normal(k1, (dim_in, 1, kernel_size, kernel_size), jnp.float32) * 0.2
    dw_b = jax.random.normal(k2, (dim_in,), jnp.float32) * 0.1
    gamma = 1.0 + 0.1 * jax.random.normal(k3, (dim_in,), jnp.float32)
    beta = 0.1 * jax.random.normal(k4, (dim_in,), jnp.float32)
    pw_w = jax.random.normal(k5, (dim_out, dim_in, 1, 1), jnp.float32) * 0.2
    pw_b = jax.random.normal(k6, (dim_out,), jnp.float32) * 0.1
    return (dw_w, dw_b, gamma, beta, pw_w, pw_b)


if __name__ == "__main__":
    # dim_in divisible by 4 (GroupNorm groups); W*C = 128 -> lane-dense packing.
    N, C_IN, C_OUT, H, W = 2, 8, 16, 16, 16

    key = jax.random.PRNGKey(0)
    kx, kp = jax.random.split(key)
    x = jax.random.normal(kx, (N, C_IN, H, W), jnp.float32)
    params = init_params(kp, C_IN, C_OUT)

    fwd = jax.jit(depthwise_conv2d_forward)
    out = jax.block_until_ready(fwd(x, params))
    ref = jax.block_until_ready(reference_forward(x, params))

    assert out.shape == (N, C_OUT, H, W), out.shape
    # Tolerance reflects the bf16 MXU 1x1 conv and bf16 output; the depthwise
    # conv and GroupNorm statistics are computed in f32 (HIGHEST precision dot).
    assert jnp.allclose(out, ref, rtol=2e-2, atol=2e-2), \
        f"max abs err {jnp.max(jnp.abs(out - ref))}"

    print("KERNEL_OK")
</pallas_src>

<mosaic_0001>
module attributes {stable_mosaic.version = 11 : i64} {
  func.func @_dw_gn_pw_kernel(%arg0: i32, %arg1: memref<1x16x128xf32, #tpu.memory_space<vmem>>, %arg2: memref<9x128xf32, #tpu.memory_space<vmem>>, %arg3: memref<128x128xf32, #tpu.memory_space<vmem>>, %arg4: memref<3x128xf32, #tpu.memory_space<vmem>>, %arg5: memref<128x256xbf16, #tpu.memory_space<vmem>>, %arg6: memref<1x256xf32, #tpu.memory_space<vmem>>, %arg7: memref<1x16x256xbf16, #tpu.memory_space<vmem>>) attributes {dimension_semantics = [#tpu.dimension_semantics<parallel>], iteration_bounds = array<i64: 2>, scalar_prefetch = 0 : i64, scratch_operands = 0 : i64, tpu.core_type = #tpu.core_type<tc>, window_params = [{transform_indices = @transform_0, window_bounds = array<i64: 1, 16, 128>}, {pipeline_mode = #tpu.pipeline_mode<synchronous>, transform_indices = @transform_1, window_bounds = array<i64: 9, 128>}, {pipeline_mode = #tpu.pipeline_mode<synchronous>, transform_indices = @transform_2, window_bounds = array<i64: 128, 128>}, {pipeline_mode = #tpu.pipeline_mode<synchronous>, transform_indices = @transform_3, window_bounds = array<i64: 3, 128>}, {pipeline_mode = #tpu.pipeline_mode<synchronous>, transform_indices = @transform_4, window_bounds = array<i64: 128, 256>}, {pipeline_mode = #tpu.pipeline_mode<synchronous>, transform_indices = @transform_5, window_bounds = array<i64: 1, 256>}, {transform_indices = @transform_6, window_bounds = array<i64: 1, 16, 256>}]} {
    %c0 = arith.constant 0 : index
    %c0_0 = arith.constant 0 : index
    %c0_1 = arith.constant 0 : index
    %0 = vector.load %arg1[%c0, %c0_0, %c0_1] : memref<1x16x128xf32, #tpu.memory_space<vmem>>, vector<1x16x128xf32>
    %1 = vector.shape_cast %0 : vector<1x16x128xf32> to vector<16x128xf32>
    %c0_2 = arith.constant 0 : index
    %c0_3 = arith.constant 0 : index
    %2 = vector.load %arg2[%c0_2, %c0_3] : memref<9x128xf32, #tpu.memory_space<vmem>>, vector<9x128xf32>
    %3 = tpu.iota {dimensions = array<i32: 1>} : vector<1x16x128xi32>
    %4 = vector.shape_cast %3 : vector<1x16x128xi32> to vector<16x128xi32>
    %c1_i32 = arith.constant 1 : i32
    %5 = tpu.dynamic_rotate %1 by %c1_i32 dim 0 : vector<16x128xf32>, i32 -> vector<16x128xf32>
    %c1_i32_4 = arith.constant 1 : i32
    %6 = vector.broadcast %c1_i32_4 : i32 to vector<16x128xi32>
    %7 = arith.cmpi sge, %4, %6 : vector<16x128xi32>
    %cst = arith.constant 0.000000e+00 : f32
    %8 = vector.broadcast %cst : f32 to vector<16x128xf32>
    %9 = arith.select %7, %5, %8 : vector<16x128xi1>, vector<16x128xf32>
    %c8_i32 = arith.constant 8 : i32
    %10 = tpu.dynamic_rotate %9 by %c8_i32 dim 1 : vector<16x128xf32>, i32 -> vector<16x128xf32>
    %11 = vector.extract_strided_slice %2 {offsets = [0, 0], sizes = [1, 128], strides = [1, 1]} : vector<9x128xf32> to vector<1x128xf32>
    %12 = vector.shape_cast %11 : vector<1x128xf32> to vector<128xf32>
    %13 = vector.shape_cast %12 : vector<128xf32> to vector<1x128xf32>
    %14 = vector.broadcast %13 : vector<1x128xf32> to vector<16x128xf32>
    %15 = arith.mulf %10, %14 : vector<16x128xf32>
    %16 = vector.extract_strided_slice %2 {offsets = [1, 0], sizes = [1, 128], strides = [1, 1]} : vector<9x128xf32> to vector<1x128xf32>
    %17 = vector.shape_cast %16 : vector<1x128xf32> to vector<128xf32>
    %18 = vector.shape_cast %17 : vector<128xf32> to vector<1x128xf32>
    %19 = vector.broadcast %18 : vector<1x128xf32> to vector<16x128xf32>
    %20 = arith.mulf %9, %19 : vector<16x128xf32>
    %21 = arith.addf %15, %20 : vector<16x128xf32>
    %c120_i32 = arith.constant 120 : i32
    %22 = tpu.dynamic_rotate %9 by %c120_i32 dim 1 : vector<16x128xf32>, i32 -> vector<16x128xf32>
    %23 = vector.extract_strided_slice %2 {offsets = [2, 0], sizes = [1, 128], strides = [1, 1]} : vector<9x128xf32> to vector<1x128xf32>
    %24 = vector.shape_cast %23 : vector<1x128xf32> to vector<128xf32>
    %25 = vector.shape_cast %24 : vector<128xf32> to vector<1x128xf32>
    %26 = vector.broadcast %25 : vector<1x128xf32> to vector<16x128xf32>
    %27 = arith.mulf %22, %26 : vector<16x128xf32>
    %28 = arith.addf %21, %27 : vector<16x128xf32>
    %c8_i32_5 = arith.constant 8 : i32
    %29 = tpu.dynamic_rotate %1 by %c8_i32_5 dim 1 : vector<16x128xf32>, i32 -> vector<16x128xf32>
    %30 = vector.extract_strided_slice %2 {offsets = [3, 0], sizes = [1, 128], strides = [1, 1]} : vector<9x128xf32> to vector<1x128xf32>
    %31 = vector.shape_cast %30 : vector<1x128xf32> to vector<128xf32>
    %32 = vector.shape_cast %31 : vector<128xf32> to vector<1x128xf32>
    %33 = vector.broadcast %32 : vector<1x128xf32> to vector<16x128xf32>
    %34 = arith.mulf %29, %33 : vector<16x128xf32>
    %35 = arith.addf %28, %34 : vector<16x128xf32>
    %36 = vector.extract_strided_slice %2 {offsets = [4, 0], sizes = [1, 128], strides = [1, 1]} : vector<9x128xf32> to vector<1x128xf32>
    %37 = vector.shape_cast %36 : vector<1x128xf32> to vector<128xf32>
    %38 = vector.shape_cast %37 : vector<128xf32> to vector<1x128xf32>
    %39 = vector.broadcast %38 : vector<1x128xf32> to vector<16x128xf32>
    %40 = arith.mulf %1, %39 : vector<16x128xf32>
    %41 = arith.addf %35, %40 : vector<16x128xf32>
    %c120_i32_6 = arith.constant 120 : i32
    %42 = tpu.dynamic_rotate %1 by %c120_i32_6 dim 1 : vector<16x128xf32>, i32 -> vector<16x128xf32>
    %43 = vector.extract_strided_slice %2 {offsets = [5, 0], sizes = [1, 128], strides = [1, 1]} : vector<9x128xf32> to vector<1x128xf32>
    %44 = vector.shape_cast %43 : vector<1x128xf32> to vector<128xf32>
    %45 = vector.shape_cast %44 : vector<128xf32> to vector<1x128xf32>
    %46 = vector.broadcast %45 : vector<1x128xf32> to vector<16x128xf32>
    %47 = arith.mulf %42, %46 : vector<16x128xf32>
    %48 = arith.addf %41, %47 : vector<16x128xf32>
    %c15_i32 = arith.constant 15 : i32
    %49 = tpu.dynamic_rotate %1 by %c15_i32 dim 0 : vector<16x128xf32>, i32 -> vector<16x128xf32>
    %c15_i32_7 = arith.constant 15 : i32
    %50 = vector.broadcast %c15_i32_7 : i32 to vector<16x128xi32>
    %51 = arith.cmpi slt, %4, %50 : vector<16x128xi32>
    %cst_8 = arith.constant 0.000000e+00 : f32
    %52 = vector.broadcast %cst_8 : f32 to vector<16x128xf32>
    %53 = arith.select %51, %49, %52 : vector<16x128xi1>, vector<16x128xf32>
    %c8_i32_9 = arith.constant 8 : i32
    %54 = tpu.dynamic_rotate %53 by %c8_i32_9 dim 1 : vector<16x128xf32>, i32 -> vector<16x128xf32>
    %55 = vector.extract_strided_slice %2 {offsets = [6, 0], sizes = [1, 128], strides = [1, 1]} : vector<9x128xf32> to vector<1x128xf32>
    %56 = vector.shape_cast %55 : vector<1x128xf32> to vector<128xf32>
    %57 = vector.shape_cast %56 : vector<128xf32> to vector<1x128xf32>
    %58 = vector.broadcast %57 : vector<1x128xf32> to vector<16x128xf32>
    %59 = arith.mulf %54, %58 : vector<16x128xf32>
    %60 = arith.addf %48, %59 : vector<16x128xf32>
    %61 = vector.extract_strided_slice %2 {offsets = [7, 0], sizes = [1, 128], strides = [1, 1]} : vector<9x128xf32> to vector<1x128xf32>
    %62 = vector.shape_cast %61 : vector<1x128xf32> to vector<128xf32>
    %63 = vector.shape_cast %62 : vector<128xf32> to vector<1x128xf32>
    %64 = vector.broadcast %63 : vector<1x128xf32> to vector<16x128xf32>
    %65 = arith.mulf %53, %64 : vector<16x128xf32>
    %66 = arith.addf %60, %65 : vector<16x128xf32>
    %c120_i32_10 = arith.constant 120 : i32
    %67 = tpu.dynamic_rotate %53 by %c120_i32_10 dim 1 : vector<16x128xf32>, i32 -> vector<16x128xf32>
    %68 = vector.extract_strided_slice %2 {offsets = [8, 0], sizes = [1, 128], strides = [1, 1]} : vector<9x128xf32> to vector<1x128xf32>
    %69 = vector.shape_cast %68 : vector<1x128xf32> to vector<128xf32>
    %70 = vector.shape_cast %69 : vector<128xf32> to vector<1x128xf32>
    %71 = vector.broadcast %70 : vector<1x128xf32> to vector<16x128xf32>
    %72 = arith.mulf %67, %71 : vector<16x128xf32>
    %73 = arith.addf %66, %72 : vector<16x128xf32>
    %c0_11 = arith.constant 0 : index
    %c0_12 = arith.constant 0 : index
    %74 = vector.load %arg4[%c0_11, %c0_12] : memref<3x128xf32, #tpu.memory_space<vmem>>, vector<1x128xf32>
    %75 = vector.shape_cast %74 : vector<1x128xf32> to vector<128xf32>
    %c1 = arith.constant 1 : index
    %c0_13 = arith.constant 0 : index
    %76 = vector.load %arg4[%c1, %c0_13] : memref<3x128xf32, #tpu.memory_space<vmem>>, vector<1x128xf32>
    %77 = vector.shape_cast %76 : vector<1x128xf32> to vector<128xf32>
    %c2 = arith.constant 2 : index
    %c0_14 = arith.constant 0 : index
    %78 = vector.load %arg4[%c2, %c0_14] : memref<3x128xf32, #tpu.memory_space<vmem>>, vector<1x128xf32>
    %79 = vector.shape_cast %78 : vector<1x128xf32> to vector<128xf32>
    %80 = vector.shape_cast %73 : vector<16x128xf32> to vector<1x16x128xf32>
    %cst_15 = arith.constant dense<0.000000e+00> : vector<1x128xf32>
    %81 = vector.multi_reduction <add>, %80, %cst_15 [1] : vector<1x16x128xf32> to vector<1x128xf32>
    %82 = arith.mulf %80, %80 : vector<1x16x128xf32>
    %cst_16 = arith.constant dense<0.000000e+00> : vector<1x128xf32>
    %83 = vector.multi_reduction <add>, %82, %cst_16 [1] : vector<1x16x128xf32> to vector<1x128xf32>
    %cst_17 = arith.constant 1.600000e+01 : f32
    %84 = vector.broadcast %cst_17 : f32 to vector<128xf32>
    %85 = arith.mulf %84, %75 : vector<128xf32>
    %86 = vector.shape_cast %85 : vector<128xf32> to vector<1x128xf32>
    %87 = arith.addf %81, %86 : vector<1x128xf32>
    %cst_18 = arith.constant 2.000000e+00 : f32
    %88 = vector.broadcast %cst_18 : f32 to vector<128xf32>
    %89 = arith.mulf %88, %75 : vector<128xf32>
    %90 = vector.shape_cast %89 : vector<128xf32> to vector<1x128xf32>
    %91 = arith.mulf %90, %81 : vector<1x128xf32>
    %92 = arith.addf %83, %91 : vector<1x128xf32>
    %93 = arith.mulf %75, %75 : vector<128xf32>
    %cst_19 = arith.constant 1.600000e+01 : f32
    %94 = vector.broadcast %cst_19 : f32 to vector<128xf32>
    %95 = arith.mulf %94, %93 : vector<128xf32>
    %96 = vector.shape_cast %95 : vector<128xf32> to vector<1x128xf32>
    %97 = arith.addf %92, %96 : vector<1x128xf32>
    %98 = tpu.concatenate %87, %97 in 0 : vector<1x128xf32>, vector<1x128xf32> -> vector<2x128xf32>
    %c0_20 = arith.constant 0 : index
    %c0_21 = arith.constant 0 : index
    %99 = vector.load %arg3[%c0_20, %c0_21] : memref<128x128xf32, #tpu.memory_space<vmem>>, vector<128x128xf32>
    %cst_22 = arith.constant dense<0.000000e+00> : vector<2x128xf32>
    %100 = tpu.matmul %98, %99, %cst_22 {dimension_numbers = #tpu.dot_dimension_numbers<[1], [0], [0], [1], [0, 0, 1, 1], [], []>, precision = #tpu.contract_precision<fp32>} : vector<2x128xf32>, vector<128x128xf32>, vector<2x128xf32> -> vector<2x128xf32>
    %cst_23 = arith.constant 0.001953125 : f32
    %101 = vector.broadcast %cst_23 : f32 to vector<2x128xf32>
    %102 = arith.mulf %100, %101 : vector<2x128xf32>
    %103 = vector.extract_strided_slice %102 {offsets = [0, 0], sizes = [1, 128], strides = [1, 1]} : vector<2x128xf32> to vector<1x128xf32>
    %104 = vector.extract_strided_slice %102 {offsets = [1, 0], sizes = [1, 128], strides = [1, 1]} : vector<2x128xf32> to vector<1x128xf32>
    %105 = arith.mulf %103, %103 : vector<1x128xf32>
    %106 = arith.subf %104, %105 : vector<1x128xf32>
    %cst_24 = arith.constant 0.000000e+00 : f32
    %107 = vector.broadcast %cst_24 : f32 to vector<1x128xf32>
    %108 = arith.maximumf %106, %107 : vector<1x128xf32>
    %cst_25 = arith.constant 9.99999974E-6 : f32
    %109 = vector.broadcast %cst_25 : f32 to vector<1x128xf32>
    %110 = arith.addf %108, %109 : vector<1x128xf32>
    %111 = math.rsqrt %110 : vector<1x128xf32>
    %112 = vector.shape_cast %77 : vector<128xf32> to vector<1x128xf32>
    %113 = arith.mulf %111, %112 : vector<1x128xf32>
    %114 = vector.shape_cast %75 : vector<128xf32> to vector<1x128xf32>
    %115 = arith.subf %114, %103 : vector<1x128xf32>
    %116 = arith.mulf %115, %113 : vector<1x128xf32>
    %117 = vector.shape_cast %79 : vector<128xf32> to vector<1x128xf32>
    %118 = arith.addf %116, %117 : vector<1x128xf32>
    %119 = vector.shape_cast %113 : vector<1x128xf32> to vector<1x1x128xf32>
    %120 = vector.broadcast %119 : vector<1x1x128xf32> to vector<1x16x128xf32>
    %121 = arith.mulf %80, %120 : vector<1x16x128xf32>
    %122 = vector.shape_cast %118 : vector<1x128xf32> to vector<1x1x128xf32>
    %123 = vector.broadcast %122 : vector<1x1x128xf32> to vector<1x16x128xf32>
    %124 = arith.addf %121, %123 : vector<1x16x128xf32>
    %125 = vector.shape_cast %124 : vector<1x16x128xf32> to vector<16x128xf32>
    %126 = arith.truncf %125 : vector<16x128xf32> to vector<16x128xbf16>
    %c0_26 = arith.constant 0 : index
    %c0_27 = arith.constant 0 : index
    %127 = vector.load %arg5[%c0_26, %c0_27] : memref<128x256xbf16, #tpu.memory_space<vmem>>, vector<128x256xbf16>
    %cst_28 = arith.constant dense<0.000000e+00> : vector<16x256xf32>
    %128 = tpu.matmul %126, %127, %cst_28 {dimension_numbers = #tpu.dot_dimension_numbers<[1], [0], [0], [1], [0, 0, 1, 1], [], []>} : vector<16x128xbf16>, vector<128x256xbf16>, vector<16x256xf32> -> vector<16x256xf32>
    %c0_29 = arith.constant 0 : index
    %c0_30 = arith.constant 0 : index
    %129 = vector.load %arg6[%c0_29, %c0_30] : memref<1x256xf32, #tpu.memory_space<vmem>>, vector<1x256xf32>
    %130 = vector.shape_cast %129 : vector<1x256xf32> to vector<256xf32>
    %131 = vector.shape_cast %130 : vector<256xf32> to vector<1x256xf32>
    %132 = vector.broadcast %131 : vector<1x256xf32> to vector<16x256xf32>
    %133 = arith.addf %128, %132 : vector<16x256xf32>
    %134 = vector.shape_cast %133 : vector<16x256xf32> to vector<1x16x256xf32>
    %135 = arith.truncf %134 : vector<1x16x256xf32> to vector<1x16x256xbf16>
    %c0_31 = arith.constant 0 : index
    %c0_32 = arith.constant 0 : index
    %c0_33 = arith.constant 0 : index
    %136 = vector.load %arg7[%c0_31, %c0_32, %c0_33] : memref<1x16x256xbf16, #tpu.memory_space<vmem>>, vector<1x16x256xbf16>
    tpu.vector_store %arg7[%c0_31, %c0_32, %c0_33], %135 {strides = array<i32>} : memref<1x16x256xbf16, #tpu.memory_space<vmem>>, vector<1x16x256xbf16>,
    return
  }
  func.func @transform_0(%arg0: i32) -> (i32, i32, i32) {
    %c0_i32 = arith.constant 0 : i32
    %c0_i32_0 = arith.constant 0 : i32
    %c0_i32_1 = arith.constant 0 : i32
    return %arg0, %c0_i32, %c0_i32_0 : i32, i32, i32
  }
  func.func @transform_1(%arg0: i32) -> (i32, i32) {
    %c0_i32 = arith.constant 0 : i32
    %c0_i32_0 = arith.constant 0 : i32
    %c0_i32_1 = arith.constant 0 : i32
    return %c0_i32, %c0_i32_0 : i32, i32
  }
  func.func @transform_2(%arg0: i32) -> (i32, i32) {
    %c0_i32 = arith.constant 0 : i32
    %c0_i32_0 = arith.constant 0 : i32
    %c0_i32_1 = arith.constant 0 : i32
    return %c0_i32, %c0_i32_0 : i32, i32
  }
  func.func @transform_3(%arg0: i32) -> (i32, i32) {
    %c0_i32 = arith.constant 0 : i32
    %c0_i32_0 = arith.constant 0 : i32
    %c0_i32_1 = arith.constant 0 : i32
    return %c0_i32, %c0_i32_0 : i32, i32
  }
  func.func @transform_4(%arg0: i32) -> (i32, i32) {
    %c0_i32 = arith.constant 0 : i32
    %c0_i32_0 = arith.constant 0 : i32
    %c0_i32_1 = arith.constant 0 : i32
    return %c0_i32, %c0_i32_0 : i32, i32
  }
  func.func @transform_5(%arg0: i32) -> (i32, i32) {
    %c0_i32 = arith.constant 0 : i32
    %c0_i32_0 = arith.constant 0 : i32
    %c0_i32_1 = arith.constant 0 : i32
    return %c0_i32, %c0_i32_0 : i32, i32
  }
  func.func @transform_6(%arg0: i32) -> (i32, i32, i32) {
    %c0_i32 = arith.constant 0 : i32
    %c0_i32_0 = arith.constant 0 : i32
    %c0_i32_1 = arith.constant 0 : i32
    return %arg0, %c0_i32, %c0_i32_0 : i32, i32, i32
  }
}

</mosaic_0001>

<bundles_post_ra>
// kernel: tile.23
= control target key start
LH: loop header
LB: loop body
LE: loop exit
PB: predicated region body
PF: predicated region fallthrough
CT: control target
= control target key end

     0   :  { %s28_s0 = inlined_call_operand.vmem [shape: f32[8], index: 0, kind: input, shape index: {}]   ;;  %s29_s1 = inlined_call_operand.vmem [shape: f32[16,8], index: 1, kind: output, shape index: {}]  }
   0x1   :  { %v4_v0 = vld [vmem:[%s28_s0] ss:$0 sm:$0xff] }
   0x2   :  { %5 = vst [vmem:[%s29_s1] sm:$0xff] %v4_v0  ;;  %8 = vst [vmem:[%s29_s1 + $0x8] sm:$0xff] %v4_v0 }

// kernel: tile.32
= control target key start
LH: loop header
LB: loop body
LE: loop exit
PB: predicated region body
PF: predicated region fallthrough
CT: control target
= control target key end

     0   :  { %s133_s10 = smov 120   ;;  %s134_s11 = smov 104   ;;  %vm3_vm0 = vcmask 64512   ;;  %vm9_vm1 = vcmask 1048512   ;;  %vm15_vm2 = vcmask 982912   ;;  %vm21_vm3 = vcmask 917312   ;;  %s209_s0 = inlined_call_operand.vmem [shape: f32[16,8], index: 0, kind: input, shape index: {}]   ;;  %s210_s1 = inlined_call_operand.vmem [shape: f32[1,128], index: 1, kind: output, shape index: {}]  }
   0x1   :  { %v103_v0 = vld [vmem:[%s209_s0 + $0xf] sm:$0x1]   ;;  %v105_v1 = vld [vmem:[%s209_s0 + $0xd] sm:$0x1]   ;;  %v104_v2 = vld [vmem:[%s209_s0 + $0xe] sm:$0x1]  }
   0x2   :  { %7 = vrot.lane.b32.xlu0 %v103_v0, %s133_s10  ;;  %19 = vrot.lane.b32.xlu1 %v105_v1, %s134_s11  ;;  %v106_v3 = vld [vmem:[%s209_s0 + $0xc] sm:$0x1]   ;;  %s135_s16 = smov 112   ;;  %s136_s17 = smov 96   ;;  %v107_v4 = vld [vmem:[%s209_s0 + $0xb] sm:$0x1]  }
   0x3   :  { %v108_v5 = vld [vmem:[%s209_s0 + $0xa] sm:$0x1]   ;;  %v2_v6 = vld [vmem:[%s209_s0] sm:$0x1]   ;;  %s137_s24 = smov 88   ;;  %s138_s25 = smov 80  }
   0x4   :  { %4 = vst.msk [vmem:[#allocation0] sm:$0x1] %vm3_vm0, %v2_v6   ;;  %v109_v7 = vld [vmem:[%s209_s0 + $0x9] sm:$0x1]   ;;  %v110_v8 = vld [vmem:[%s209_s0 + $0x8] sm:$0x1]  }
   0x5   :  { %s139_s30 = smov 72   ;;  %s140_s2 = smov 64   ;;  %v111_v9 = vld [vmem:[%s209_s0 + $0x7] sm:$0x1]   ;;  %v112_v10 = vld [vmem:[%s209_s0 + $0x6] sm:$0x1]  }
   0x6   :  { %13 = vrot.lane.b32.xlu0 %v104_v2, %s135_s16  ;;  %25 = vrot.lane.b32.xlu1 %v106_v3, %s136_s17  ;;  %s141_s7 = smov 56   ;;  %s142_s8 = smov 48   ;;  %v113_v11 = vld [vmem:[%s209_s0 + $0x5] sm:$0x1]   ;;  %v114_v12 = vld [vmem:[%s209_s0 + $0x4] sm:$0x1]  }
   0x7   :  { %s143_s13 = smov 40   ;;  %s144_s14 = smov 32   ;;  %v115_v13 = vld [vmem:[%s209_s0 + $0x3] sm:$0x1]   ;;  %v116_v14 = vld [vmem:[%s209_s0 + $0x2] sm:$0x1]  }
   0x8   :  { %s145_s19 = smov 24   ;;  %s146_s20 = smov 16   ;;  %v117_v15 = vld [vmem:[%s209_s0 + $0x1] sm:$0x1]   ;;  %vm27_vm4 = vcmask 851712   ;;  %vm33_vm5 = vcmask 786112  }
   0x9   :  { %s147_s0 = smov 8   ;;  %vm39_vm6 = vcmask 720512   ;;  %vm45_vm7 = vcmask 654912   ;;  %vm51_vm8 = vcmask 589312   ;;  %vm57_vm9 = vcmask 523712  }
   0xa   :  { %31 = vrot.lane.b32.xlu0 %v107_v4, %s137_s24  ;;  %37 = vrot.lane.b32.xlu1 %v108_v5, %s138_s25  ;;  %vm63_vm10 = vcmask 458112   ;;  %vm69_vm11 = vcmask 392512   ;;  %vm75_vm12 = vcmask 326912   ;;  %vm81_vm13 = vcmask 261312  }
   0xb   :  { %vm87_vm14 = vcmask 195712   ;;  %vm93_vm15 = vcmask 130112  }
   0xe   :  { %43 = vrot.lane.b32.xlu0 %v109_v7, %s139_s30  ;;  %49 = vrot.lane.b32.xlu1 %v110_v8, %s140_s2 }
  0x12   :  { %55 = vrot.lane.b32.xlu0 %v111_v9, %s141_s7  ;;  %61 = vrot.lane.b32.xlu1 %v112_v10, %s142_s8 }
  0x16   :  { %67 = vrot.lane.b32.xlu0 %v113_v11, %s143_s13  ;;  %73 = vrot.lane.b32.xlu1 %v114_v12, %s144_s14 }
  0x1a   :  { %79 = vrot.lane.b32.xlu0 %v115_v13, %s145_s19  ;;  %85 = vrot.lane.b32.xlu1 %v116_v14, %s146_s20 }
  0x1e   :  { %91 = vrot.lane.b32.xlu0 %v117_v15, %s147_s0 }
  0x74   :  { %v8_v16 = vpop.permute.xlu0 %7   ;;  %v20_v17 = vpop.permute.xlu1 %19  }
  0x75   :  { %10 = vst.msk [vmem:[#allocation0] sm:$0x1] %vm9_vm1, %v8_v16  }
  0x78   :  { %v14_v18 = vpop.permute.xlu0 %13   ;;  %v26_v19 = vpop.permute.xlu1 %25  }
  0x79   :  { %16 = vst.msk [vmem:[#allocation0] sm:$0x1] %vm15_vm2, %v14_v18  }
  0x7a   :  { %22 = vst.msk [vmem:[#allocation0] sm:$0x1] %vm21_vm3, %v20_v17  }
  0x7b   :  { %28 = vst.msk [vmem:[#allocation0] sm:$0x1] %vm27_vm4, %v26_v19  }
  0x7c   :  { %v32_v20 = vpop.permute.xlu0 %31   ;;  %v38_v21 = vpop.permute.xlu1 %37  }
  0x7d   :  { %34 = vst.msk [vmem:[#allocation0] sm:$0x1] %vm33_vm5, %v32_v20  }
  0x7e   :  { %40 = vst.msk [vmem:[#allocation0] sm:$0x1] %vm39_vm6, %v38_v21  }
  0x80   :  { %v44_v22 = vpop.permute.xlu0 %43   ;;  %v50_v23 = vpop.permute.xlu1 %49  }
  0x81   :  { %46 = vst.msk [vmem:[#allocation0] sm:$0x1] %vm45_vm7, %v44_v22  }
  0x82   :  { %52 = vst.msk [vmem:[#allocation0] sm:$0x1] %vm51_vm8, %v50_v23  }
  0x84   :  { %v56_v24 = vpop.permute.xlu0 %55   ;;  %v62_v25 = vpop.permute.xlu1 %61  }
  0x85   :  { %58 = vst.msk [vmem:[#allocation0] sm:$0x1] %vm57_vm9, %v56_v24  }
  0x86   :  { %64 = vst.msk [vmem:[#allocation0] sm:$0x1] %vm63_vm10, %v62_v25  }
  0x88   :  { %v68_v26 = vpop.permute.xlu0 %67   ;;  %v74_v27 = vpop.permute.xlu1 %73  }
  0x89   :  { %70 = vst.msk [vmem:[#allocation0] sm:$0x1] %vm69_vm11, %v68_v26  }
  0x8a   :  { %76 = vst.msk [vmem:[#allocation0] sm:$0x1] %vm75_vm12, %v74_v27  }
  0x8c   :  { %v80_v28 = vpop.permute.xlu0 %79   ;;  %v86_v29 = vpop.permute.xlu1 %85  }
  0x8d   :  { %82 = vst.msk [vmem:[#allocation0] sm:$0x1] %vm81_vm13, %v80_v28  }
  0x8e   :  { %88 = vst.msk [vmem:[#allocation0] sm:$0x1] %vm87_vm14, %v86_v29  }
  0x90   :  { %v92_v30 = vpop.permute.xlu0 %91  }
  0x91   :  { %94 = vst.msk [vmem:[#allocation0] sm:$0x1] %vm93_vm15, %v92_v30  }
  0x98   :  { %v99_v31 = vld [vmem:[#allocation0] sm:$0x1] }
  0x99   :  { %102 = vst [vmem:[%s210_s1] sm:$0x1] %v99_v31 }

// kernel: tile.38
= control target key start
LH: loop header
LB: loop body
LE: loop exit
PB: predicated region body
PF: predicated region fallthrough
CT: control target
= control target key end

     0   :  { %s28_s0 = inlined_call_operand.vmem [shape: f32[16], index: 0, kind: input, shape index: {}]   ;;  %s29_s1 = inlined_call_operand.vmem [shape: f32[16,16], index: 1, kind: output, shape index: {}]  }
   0x1   :  { %v4_v0 = vld [vmem:[%s28_s0] ss:$0 sm:$0xff] }
   0x2   :  { %5 = vst [vmem:[%s29_s1] sm:$0xff] %v4_v0  ;;  %8 = vst [vmem:[%s29_s1 + $0x8] sm:$0xff] %v4_v0 }

// kernel: tile.39
= control target key start
LH: loop header
LB: loop body
LE: loop exit
PB: predicated region body
PF: predicated region fallthrough
CT: control target
= control target key end

     0   :  { %s7_s6 = smov 3  ;;  %s21_s9 = smov 3  ;;  %vm4_vm0 = vcmask 130048   ;;  %vm11_vm1 = vcmask 1048448   ;;  %vm18_vm2 = vcmask 917248   ;;  %vm25_vm3 = vcmask 786048   ;;  %s131_s0 = inlined_call_operand.vmem [shape: f32[16,16], index: 0, kind: input, shape index: {}]   ;;  %s132_s1 = inlined_call_operand.vmem [shape: f32[1,256], index: 1, kind: output, shape index: {}]  }
   0x1   :  { %v69_v0 = vld [vmem:[%s131_s0 + $0x7] ss:$8 sm:%s7_s6]   ;;  %s84_s10 = smov 112   ;;  %v71_v1 = vld [vmem:[%s131_s0 + $0x5] ss:$8 sm:%s21_s9]   ;;  %s14_s13 = smov 3 }
   0x2   :  { %9 = vrot.lane.b32.xlu0 %v69_v0, %s84_s10  ;;  %s85_s14 = smov 80   ;;  %v70_v2 = vld [vmem:[%s131_s0 + $0x6] ss:$8 sm:%s14_s13]   ;;  %s28_s17 = smov 3  ;;  %vm32_vm4 = vcmask 654848   ;;  %vm39_vm5 = vcmask 523648  }
   0x3   :  { %23 = vrot.lane.b32.xlu1 %v71_v1, %s85_s14  ;;  %v72_v3 = vld [vmem:[%s131_s0 + $0x4] ss:$8 sm:%s28_s17]   ;;  %s35_s20 = smov 3  ;;  %s42_s21 = smov 3  ;;  %vm46_vm6 = vcmask 392448   ;;  %vm53_vm7 = vcmask 261248  }
   0x4   :  { %s86_s22 = smov 96   ;;  %s87_s23 = smov 64   ;;  %v73_v4 = vld [vmem:[%s131_s0 + $0x3] ss:$8 sm:%s35_s20]   ;;  %v74_v5 = vld [vmem:[%s131_s0 + $0x2] ss:$8 sm:%s42_s21]  }
   0x5   :  { %s2_s26 = smov 3  ;;  %s49_s29 = smov 3 }
   0x6   :  { %16 = vrot.lane.b32.xlu0 %v70_v2, %s86_s22  ;;  %v3_v6 = vld [vmem:[%s131_s0] ss:$8 sm:%s2_s26]   ;;  %s88_s3 = smov 48   ;;  %s89_s4 = smov 32  }
   0x7   :  { %30 = vrot.lane.b32.xlu1 %v72_v3, %s87_s23  ;;  %5 = vst.msk [vmem:[#allocation0] ss:$8 sm:$0x3] %vm4_vm0, %v3_v6   ;;  %v75_v7 = vld [vmem:[%s131_s0 + $0x1] ss:$8 sm:%s49_s29]   ;;  %s90_s0 = smov 16  }
   0xa   :  { %37 = vrot.lane.b32.xlu0 %v73_v4, %s88_s3 }
   0xb   :  { %44 = vrot.lane.b32.xlu1 %v74_v5, %s89_s4 }
   0xe   :  { %51 = vrot.lane.b32.xlu0 %v75_v7, %s90_s0 }
  0x74   :  { %v10_v8 = vpop.permute.xlu0 %9  }
  0x75   :  { %12 = vst.msk [vmem:[#allocation0] ss:$8 sm:$0x3] %vm11_vm1, %v10_v8   ;;  %v24_v9 = vpop.permute.xlu1 %23  }
  0x78   :  { %v17_v10 = vpop.permute.xlu0 %16  }
  0x79   :  { %19 = vst.msk [vmem:[#allocation0] ss:$8 sm:$0x3] %vm18_vm2, %v17_v10   ;;  %v31_v11 = vpop.permute.xlu1 %30  }
  0x7a   :  { %26 = vst.msk [vmem:[#allocation0] ss:$8 sm:$0x3] %vm25_vm3, %v24_v9  }
  0x7b   :  { %33 = vst.msk [vmem:[#allocation0] ss:$8 sm:$0x3] %vm32_vm4, %v31_v11  }
  0x7c   :  { %v38_v12 = vpop.permute.xlu0 %37  }
  0x7d   :  { %40 = vst.msk [vmem:[#allocation0] ss:$8 sm:$0x3] %vm39_vm5, %v38_v12   ;;  %v45_v13 = vpop.permute.xlu1 %44  }
  0x7e   :  { %47 = vst.msk [vmem:[#allocation0] ss:$8 sm:$0x3] %vm46_vm6, %v45_v13  }
  0x80   :  { %v52_v14 = vpop.permute.xlu0 %51  }
  0x81   :  { %54 = vst.msk [vmem:[#allocation0] ss:$8 sm:$0x3] %vm53_vm7, %v52_v14  }
  0x88   :  { %v59_v15 = vld [vmem:[#allocation0] sm:$0x1]  ;;  %v64_v16 = vld [vmem:[#allocation0 + $0x8] sm:$0x1] }
  0x89   :  { %62 = vst [vmem:[%s132_s1] sm:$0x1] %v59_v15  ;;  %76 = vst [vmem:[%s132_s1 + $0x1] sm:$0x1] %v64_v16 }

// kernel: depthwise_conv2d_forward.1
= control target key start
LH: loop header
LB: loop body
LE: loop exit
PB: predicated region body
PF: predicated region fallthrough
CT: control target
= control target key end

     0   :  { %s1746_s21 = smov 0   ;;  %s2281_s0 = inlined_call_operand.vmem [shape: f32[2,16,128], index: 0, kind: input, shape index: {}]   ;;  %s2282_s1 = inlined_call_operand.vmem [shape: f32[9,128], index: 1, kind: input, shape index: {}]   ;;  %s2283_s2 = inlined_call_operand.vmem [shape: f32[128,128], index: 2, kind: input, shape index: {}]   ;;  %s2284_s3 = inlined_call_operand.vmem [shape: f32[3,128], index: 3, kind: input, shape index: {}]   ;;  %s2285_s4 = inlined_call_operand.vmem [shape: bf16[128,256], index: 4, kind: input, shape index: {}]   ;;  %s2286_s5 = inlined_call_operand.vmem [shape: f32[1,256], index: 5, kind: input, shape index: {}]   ;;  %s2287_s6 = inlined_call_operand.vmem [shape: bf16[2,16,256], index: 6, kind: output, shape index: {}]  }
   0x1 LB: > { %s1313_s22 = sadd.s32 4294967295, %s1704_s21   ;;  %p1317_p0 = scmp.ge.s32.totalorder %s1704_s21, 1  ;;  %s1704_s21 = sphi %s1746_s21, %s16_s21  }
   0x2   : > { %p212_p1 = scmp.lt.s32.totalorder %s1704_s21, 3 }
   0x4   : > { %p213_p2 = pnand %p1317_p0, %p212_p1 }
   0x5   : > { %p242_p3 = scmp.lt.s32.totalorder (!%p213_p2), %s1313_s22, 1  ;;  %s1706_s29 = smov (!%p213_p2), 120  }
   0x6   : > { %216 = sbr.rel (%p213_p2) target bundleno = 726 (0x2d6), region = 44  ;;  %s1707_s30 = smov (!%p213_p2), 8  }
   0xb   : > { %v257_v0 = vlaneseq  ;;  %s2292_s22 = smov (!%p242_p3, %s1313_s22), 1  ;;  %v1768_v3 = vld [vmem:[%s2282_s1] sm:$0xff]  ;;  %v419_v22 = vld [vmem:[%s2283_s2 + $0x78] sm:$0xff]  ;;  %v418_v26 = vld [vmem:[%s2283_s2 + $0x70] sm:$0xff]  ;;  %v2288_v29 = vmov 0.0   ;;  %vm1709_vm4 = vmmov 0  }
   0xc   : > { %s1343_s23 = sshll.u32 %s2292_s22, 4  ;;  %v1799_v23 = vand.u32 4294901760, %v419_v22  ;;  %v1814_v28 = vand.u32 4294901760, %v418_v26  ;;  %1519 = vmatprep.subr.mxu0 %v2288_v29  ;;  %v417_v30 = vld [vmem:[%s2283_s2 + $0x68] sm:$0xff]  ;;  %1449 = vmatprep.subr.mxu1 %v2288_v29  ;;  %v416_v33 = vld [vmem:[%s2283_s2 + $0x60] sm:$0xff]  ;;  %v415_v36 = vld [vmem:[%s2283_s2 + $0x58] sm:$0xff] }
   0xd   : > { %v1756_v1 = vshrl.u32 %v257_v0, 7  ;;  %s246_s26 = scalar_lea.vmem %s2281_s0, %s1343_s23  ;;  %v1825_v32 = vand.u32 4294901760, %v417_v30  ;;  %v1839_v35 = vand.u32 4294901760, %v416_v33  ;;  %v1850_v38 = vand.u32 4294901760, %v415_v36  ;;  %v414_v39 = vld [vmem:[%s2283_s2 + $0x50] sm:$0xff]  ;;  %v413_v42 = vld [vmem:[%s2283_s2 + $0x48] sm:$0xff]  ;;  %1551 = vmatprep.mubr.msk.f32.mxu0 %vm1709_vm4, %v2288_v29  ;;  %1481 = vmatprep.mubr.msk.f32.mxu1 %vm1709_vm4, %v2288_v29  ;;  %s251_s20 = scalar_lea.vmem %s2287_s6, %s1343_s23 }
   0xe   : > { %v253_v5 = vld [vmem:[%s246_s26] sm:$0xff]  ;;  %v254_v6 = vld [vmem:[%s246_s26 + $0x8] sm:$0xff]  ;;  %v1812_v27 = vsub.f32 %v419_v22, %v1799_v23  ;;  %v1823_v31 = vsub.f32 %v418_v26, %v1814_v28  ;;  %1450 = vmatpush3.msra.mxu1 %v1799_v23  ;;  %v1860_v40 = vand.u32 4294901760, %v414_v39  ;;  %v1872_v43 = vand.u32 4294901760, %v413_v42  ;;  %v411_v47 = vld [vmem:[%s2283_s2 + $0x38] sm:$0xff] }
   0xf   : > { %v259_v2 = vadd.s32 8, %v1756_v1  ;;  %vm262_vm0 = vcmp.lt.s32.totalorder %v1756_v1, 1  ;;  %v354_v4 = vsub.s32 7, %v1756_v1  ;;  %vm333_vm1 = vcmp.lt.s32.totalorder %v1756_v1, 7  ;;  %1451 = vmatprep.subr.mxu1 %v2288_v29  ;;  %v412_v45 = vld [vmem:[%s2283_s2 + $0x40] sm:$0xff]  ;;  %v410_v50 = vld [vmem:[%s2283_s2 + $0x30] sm:$0xff] }
  0x10   : > { %v313_v7 = vsub.s32 4, %v1756_v1  ;;  %v260_v8 = vrot.slane %v253_v5, 7  ;;  %v261_v9 = vrot.slane %v254_v6, 7  ;;  %v331_v10 = vrot.slane %v253_v5, 1  ;;  %1520 = vmatpush3.msra.mxu0 %v1812_v27  ;;  %1452 = vmatpush3.msra.mxu1 %v1814_v28  ;;  %v409_v53 = vld [vmem:[%s2283_s2 + $0x28] sm:$0xff]  ;;  %v408_v56 = vld [vmem:[%s2283_s2 + $0x20] sm:$0xff] }
  0x11   : > { %vm337_vm2 = vcmp.lt.s32.totalorder %v259_v2, 15  ;;  %v332_v11 = vrot.slane %v254_v6, 1  ;;  %vm265_vm3 = vcmp.ge.s32.totalorder %v1756_v1, 1  ;;  %v355_v12 = vrot.slane %v1768_v3, %v354_v4  ;;  %1521 = vmatprep.subr.mxu0 %v2288_v29  ;;  %1453 = vmatprep.subr.mxu1 %v2288_v29  ;;  %v407_v57 = vld [vmem:[%s2283_s2 + $0x18] sm:$0xff]  ;;  %v406_v60 = vld [vmem:[%s2283_s2 + $0x10] sm:$0xff]  ;;  %v405_v63 = vld [vmem:[%s2283_s2 + $0x8] sm:$0xff] }
  0x12   : > { %v1776_v13 = vsel %vm262_vm0, %v260_v8, %v261_v9  ;;  %v264_v14 = vsel %vm262_vm0, %v261_v9, %v260_v8  ;;  %v314_v21 = vrot.slane %v1768_v3, %v313_v7  ;;  %v1837_v34 = vsub.f32 %v417_v30, %v1825_v32  ;;  %1522 = vmatpush3.msra.mxu0 %v1823_v31  ;;  %v404_v4 = vld [vmem:[%s2283_s2] sm:$0xff] }
  0x13   : > { %v335_v15 = vsel %vm333_vm1, %v332_v11, %v331_v10  ;;  %v1778_v16 = vsel %vm333_vm1, %v331_v10, %v332_v11  ;;  %289 = vrot.lane.b32.xlu1 %v1776_v13, %s1706_s29  ;;  %271 = vrot.lane.b32.xlu0 %v1776_v13, %s1707_s30  ;;  %v1790_v19 = vsel %vm265_vm3, %v264_v14, 0.0  ;;  %v1848_v37 = vsub.f32 %v416_v33, %v1839_v35 }
  0x14   : > { %v1785_v17 = vsel %vm337_vm2, %v335_v15, 0.0  ;;  %v1788_v18 = vmul.f32 %v355_v12, %v1778_v16  ;;  %v1801_v24 = vmul.f32 %v314_v21, %v254_v6  ;;  %v1803_v25 = vmul.f32 %v314_v21, %v253_v5  ;;  %1523 = vmatprep.subr.mxu0 %v2288_v29  ;;  %1454 = vmatpush3.msra.mxu1 %v1825_v32 }
  0x15   : > { %v1793_v20 = vmul.f32 %v355_v12, %v1785_v17  ;;  %1524 = vmatpush3.msra.mxu0 %v1837_v34  ;;  %v1864_v41 = vsub.f32 %v415_v36, %v1850_v38  ;;  %1455 = vmatprep.subr.mxu1 %v2288_v29  ;;  %v1876_v44 = vsub.f32 %v414_v39, %v1860_v40  ;;  %v1886_v46 = vand.u32 4294901760, %v412_v45 }
  0x16   : > { %1525 = vmatprep.subr.mxu0 %v2288_v29  ;;  %1456 = vmatpush3.msra.mxu1 %v1839_v35  ;;  %v1895_v48 = vsub.f32 %v413_v42, %v1872_v43  ;;  %v1898_v49 = vand.u32 4294901760, %v411_v47  ;;  %v1912_v52 = vand.u32 4294901760, %v410_v50  ;;  %v1924_v55 = vand.u32 4294901760, %v409_v53 }
  0x17   : > { %301 = vrot.lane.b32.xlu1 %v254_v6, %s1707_s30  ;;  %269 = vrot.lane.b32.xlu0 %v1790_v19, %s1707_s30  ;;  %v1910_v51 = vsub.f32 %v412_v45, %v1886_v46  ;;  %v1939_v59 = vand.u32 4294901760, %v408_v56  ;;  %v1951_v62 = vand.u32 4294901760, %v407_v57  ;;  %v1963_v2 = vand.u32 4294901760, %v406_v60 }
  0x18   : > { %1526 = vmatpush3.msra.mxu0 %v1848_v37  ;;  %1457 = vmatprep.subr.mxu1 %v2288_v29  ;;  %v1921_v54 = vsub.f32 %v411_v47, %v1898_v49  ;;  %v1936_v58 = vsub.f32 %v410_v50, %v1912_v52  ;;  %v1948_v61 = vsub.f32 %v409_v53, %v1924_v55  ;;  %v1984_v8 = vand.u32 4294901760, %v404_v4 }
  0x19   : > { %1527 = vmatprep.subr.mxu0 %v2288_v29  ;;  %1458 = vmatpush3.msra.mxu1 %v1850_v38  ;;  %v1960_v0 = vsub.f32 %v408_v56, %v1939_v59  ;;  %v1981_v7 = vsub.f32 %v406_v60, %v1963_v2  ;;  %v2015_v11 = vsub.s32 1, %v1756_v1  ;;  %v2018_v12 = vsub.s32 0, %v1756_v1 }
  0x1a   : > { %1528 = vmatpush3.msra.mxu0 %v1864_v41  ;;  %1459 = vmatprep.subr.mxu1 %v2288_v29  ;;  %v1997_v10 = vsub.f32 %v404_v4, %v1984_v8  ;;  %v293_v15 = vsub.s32 2, %v1756_v1  ;;  %v325_v60 = vsub.s32 5, %v1756_v1  ;;  %vm402_vm5 = vcmask 1040384  }
  0x1b   : > { %287 = vrot.lane.b32.xlu1 %v1790_v19, %s1706_s29  ;;  %299 = vrot.lane.b32.xlu0 %v253_v5, %s1707_s30  ;;  %v282_v14 = vrot.slane %v1768_v3, %v2015_v11 }
  0x1c   : > { %1529 = vmatprep.subr.mxu0 %v2288_v29  ;;  %1460 = vmatpush3.msra.mxu1 %v1860_v40  ;;  %v294_v22 = vrot.slane %v1768_v3, %v293_v15  ;;  %v346_v15 = vsub.s32 6, %v1756_v1 }
  0x1d   : > { %1530 = vmatpush3.msra.mxu0 %v1876_v44  ;;  %1461 = vmatprep.subr.mxu1 %v2288_v29  ;;  %v284_v21 = vmul.f32 %v282_v14, %v1776_v13  ;;  %v283_v45 = vmul.f32 %v282_v14, %v1790_v19 }
  0x1e   : > { %1531 = vmatprep.subr.mxu0 %v2288_v29  ;;  %1462 = vmatpush3.msra.mxu1 %v1872_v43 }
  0x1f   : > { %321 = vrot.lane.b32.xlu1 %v254_v6, %s1706_s29  ;;  %319 = vrot.lane.b32.xlu0 %v253_v5, %s1706_s29  ;;  %v1972_v5 = vsub.f32 %v407_v57, %v1951_v62  ;;  %v1975_v6 = vand.u32 4294901760, %v405_v63 }
  0x20   : > { %1532 = vmatpush3.msra.mxu0 %v1895_v48  ;;  %1463 = vmatprep.subr.mxu1 %v2288_v29 }
  0x21   : > { %1533 = vmatprep.subr.mxu0 %v2288_v29  ;;  %1464 = vmatpush3.msra.mxu1 %v1886_v46  ;;  %v1990_v9 = vsub.f32 %v405_v63, %v1975_v6 }
  0x22   : > { %1534 = vmatpush3.msra.mxu0 %v1910_v51  ;;  %1465 = vmatprep.subr.mxu1 %v2288_v29 }
  0x23   : > { %342 = vrot.lane.b32.xlu1 %v1785_v17, %s1707_s30  ;;  %340 = vrot.lane.b32.xlu0 %v1778_v16, %s1707_s30 }
  0x24   : > { %1535 = vmatprep.subr.mxu0 %v2288_v29  ;;  %1466 = vmatpush3.msra.mxu1 %v1898_v49 }
  0x25   : > { %1536 = vmatpush3.msra.mxu0 %v1921_v54  ;;  %1467 = vmatprep.subr.mxu1 %v2288_v29 }
  0x26   : > { %1537 = vmatprep.subr.mxu0 %v2288_v29  ;;  %1468 = vmatpush3.msra.mxu1 %v1912_v52 }
  0x27   : > { %362 = vrot.lane.b32.xlu1 %v1785_v17, %s1706_s29  ;;  %360 = vrot.lane.b32.xlu0 %v1778_v16, %s1706_s29  ;;  %v276_v16 = vrot.slane %v1768_v3, %v2018_v12  ;;  %v305_v17 = vsub.s32 3, %v1756_v1 }
  0x28   : > { %1538 = vmatpush3.msra.mxu0 %v1936_v58  ;;  %1469 = vmatprep.subr.mxu1 %v2288_v29 }
  0x29   : > { %1539 = vmatprep.subr.mxu0 %v2288_v29  ;;  %1470 = vmatpush3.msra.mxu1 %v1924_v55  ;;  %v306_v36 = vrot.slane %v1768_v3, %v305_v17  ;;  %v326_v17 = vrot.slane %v1768_v3, %v325_v60 }
  0x2a   : > { %1540 = vmatpush3.msra.mxu0 %v1948_v61  ;;  %1471 = vmatprep.subr.mxu1 %v2288_v29 }
  0x2b   : > { %1541 = vmatprep.subr.mxu0 %v2288_v29  ;;  %1472 = vmatpush3.msra.mxu1 %v1939_v59 }
  0x2c   : > { %1542 = vmatpush3.msra.mxu0 %v1960_v0  ;;  %1473 = vmatprep.subr.mxu1 %v2288_v29 }
  0x2d   : > { %1543 = vmatprep.subr.mxu0 %v2288_v29  ;;  %1474 = vmatpush3.msra.mxu1 %v1951_v62 }
  0x2e   : > { %1544 = vmatpush3.msra.mxu0 %v1972_v5  ;;  %1475 = vmatprep.subr.mxu1 %v2288_v29 }
  0x2f   : > { %1545 = vmatprep.subr.mxu0 %v2288_v29  ;;  %1476 = vmatpush3.msra.mxu1 %v1963_v2 }
  0x30   : > { %1546 = vmatpush3.msra.mxu0 %v1981_v7  ;;  %1477 = vmatprep.subr.mxu1 %v2288_v29 }
  0x31   : > { %1547 = vmatprep.subr.mxu0 %v2288_v29  ;;  %1478 = vmatpush3.msra.mxu1 %v1975_v6 }
  0x32   : > { %1548 = vmatpush3.msra.mxu0 %v1990_v9  ;;  %1479 = vmatprep.subr.mxu1 %v2288_v29 }
  0x33   : > { %1549 = vmatprep.subr.mxu0 %v2288_v29  ;;  %1480 = vmatpush3.msra.mxu1 %v1984_v8 }
  0x34   : > { %1550 = vmatpush3.msra.mxu0 %v1997_v10  ;;  %1484 = vmatprep.subr.mxu1 %v2288_v29 }
  0x35   : > { %1589 = vmatprep.subr.mxu0 %v2288_v29 }
  0x85   : > { %v290_v26 = vpop.permute.xlu1 %289  ;;  %v272_v30 = vpop.permute.xlu0 %271 }
  0x86   : > { %v278_v33 = vmul.f32 %v276_v16, %v272_v30  ;;  %v296_v39 = vmul.f32 %v294_v22, %v290_v26 }
  0x88   : > { %v286_v42 = vadd.f32 %v284_v21, %v278_v33 }
  0x89   : > { %v302_v47 = vpop.permute.xlu1 %301  ;;  %v270_v50 = vpop.permute.xlu0 %269 }
  0x8a   : > { %v298_v53 = vadd.f32 %v296_v39, %v286_v42  ;;  %v308_v56 = vmul.f32 %v306_v36, %v302_v47  ;;  %v277_v57 = vmul.f32 %v276_v16, %v270_v50  ;;  %v347_v16 = vrot.slane %v1768_v3, %v346_v15 }
  0x8c   : > { %v310_v63 = vadd.f32 %v308_v56, %v298_v53  ;;  %v285_v29 = vadd.f32 %v283_v45, %v277_v57 }
  0x8d   : > { %v288_v13 = vpop.permute.xlu1 %287  ;;  %v300_v4 = vpop.permute.xlu0 %299 }
  0x8e   : > { %v295_v30 = vmul.f32 %v294_v22, %v288_v13  ;;  %v318_v21 = vadd.f32 %v1801_v24, %v310_v63  ;;  %v307_v19 = vmul.f32 %v306_v36, %v300_v4  ;;  %v1322_v24 = vld [vmem:[%s2282_s1 + $0x8] ss:$0 sm:$0xff] }
  0x90   : > { %v297_v26 = vadd.f32 %v295_v30, %v285_v29 }
  0x91   : > { %v322_v14 = vpop.permute.xlu1 %321  ;;  %v320_v33 = vpop.permute.xlu0 %319 }
  0x92   : > { %v309_v39 = vadd.f32 %v307_v19, %v297_v26  ;;  %v328_v42 = vmul.f32 %v326_v17, %v322_v14  ;;  %v327_v53 = vmul.f32 %v326_v17, %v320_v33 }
  0x94   : > { %v330_v47 = vadd.f32 %v328_v42, %v318_v21  ;;  %v317_v50 = vadd.f32 %v1803_v25, %v309_v39  ;;  %v2054_v42 = vld [vmem:[%s2284_s3] sm:$0x1] }
  0x95   : > { %v343_v56 = vpop.permute.xlu1 %342  ;;  %v341_v1 = vpop.permute.xlu0 %340 }
  0x96   : > { %v329_v45 = vadd.f32 %v327_v53, %v317_v50  ;;  %v349_v22 = vmul.f32 %v347_v16, %v343_v56  ;;  %v348_v57 = vmul.f32 %v347_v16, %v341_v1  ;;  %v393_v56 = vmul.f32 2.0, %v2054_v42 }
  0x97   : > { %v396_v1 = vmul.f32 %v2054_v42, %v2054_v42 }
  0x98   : > { %v351_v29 = vadd.f32 %v349_v22, %v330_v47  ;;  %v350_v36 = vadd.f32 %v348_v57, %v329_v45 }
  0x99   : > { %v363_v60 = vpop.permute.xlu1 %362  ;;  %v361_v63 = vpop.permute.xlu0 %360 }
  0x9a   : > { %v359_v13 = vadd.f32 %v1793_v20, %v351_v29  ;;  %v369_v3 = vmul.f32 %v1322_v24, %v363_v60  ;;  %v358_v4 = vadd.f32 %v1788_v18, %v350_v36  ;;  %v368_v25 = vmul.f32 %v1322_v24, %v361_v63 }
  0x9b   : > { %v397_v29 = vmul.f32 16.0, %v396_v1  ;;  %v391_v36 = vmul.f32 16.0, %v2054_v42 }
  0x9c   : > { %v2041_v15 = vadd.f32 %v369_v3, %v359_v13  ;;  %v2043_v30 = vadd.f32 %v368_v25, %v358_v4 }
  0x9e   : > { %v383_v17 = vmul.f32 %v2041_v15, %v2041_v15  ;;  %v375_v21 = vadd.f32 %v2041_v15, %v2043_v30  ;;  %v382_v26 = vmul.f32 %v2043_v30, %v2043_v30 }
  0xa0   : > { %v376_v19 = vrot.slane %v375_v21, 4  ;;  %v384_v14 = vadd.f32 %v383_v17, %v382_v26  ;;  %v514_v17 = vand.u32 4294901760, %v1812_v27  ;;  %v521_v26 = vand.u32 4294901760, %v1823_v31 }
  0xa2   : > { %v377_v20 = vadd.f32 %v376_v19, %v375_v21  ;;  %v385_v33 = vrot.slane %v384_v14, 4  ;;  %v515_v19 = vsub.f32 %v1812_v27, %v514_v17 }
  0xa4   : > { %v378_v39 = vrot.slane %v377_v20, 2  ;;  %v386_v18 = vadd.f32 %v385_v33, %v384_v14  ;;  %v522_v33 = vsub.f32 %v1823_v31, %v521_v26  ;;  %v516_v27 = vand.u32 4294901760, %v515_v19 }
  0xa6   : > { %v379_v16 = vadd.f32 %v378_v39, %v377_v20  ;;  %v387_v47 = vrot.slane %v386_v18, 2  ;;  %v528_v20 = vand.u32 4294901760, %v1837_v34  ;;  %v2290_v39 = vmov 0.0  }
  0xa7   : > { %v523_v31 = vand.u32 4294901760, %v522_v33 }
  0xa8   : > { %v380_v50 = vrot.slane %v379_v16, 1  ;;  %v388_v53 = vadd.f32 %v387_v47, %v386_v18  ;;  %v529_v47 = vsub.f32 %v1837_v34, %v528_v20 }
  0xaa   : > { %v389_v45 = vrot.slane %v388_v53, 1  ;;  %v381_v22 = vadd.f32 %v380_v50, %v379_v16  ;;  %v535_v16 = vand.u32 4294901760, %v1848_v37  ;;  %v530_v1 = vand.u32 4294901760, %v529_v47 }
  0xac   : > { %v390_v57 = vadd.f32 %v389_v45, %v388_v53  ;;  %v394_v24 = vmul.f32 %v393_v56, %v381_v22  ;;  %v392_v13 = vadd.f32 %v391_v36, %v381_v22  ;;  %v542_v53 = vand.u32 4294901760, %v1864_v41 }
  0xad   : > { %v536_v56 = vsub.f32 %v1848_v37, %v535_v16  ;;  %v549_v45 = vand.u32 4294901760, %v1876_v44 }
  0xae   : > { %v395_v60 = vadd.f32 %v394_v24, %v390_v57  ;;  %v543_v22 = vsub.f32 %v1864_v41, %v542_v53  ;;  %v556_v57 = vand.u32 4294901760, %v1895_v48  ;;  %v563_v41 = vand.u32 4294901760, %v1910_v51 }
  0xaf   : > { %v537_v34 = vand.u32 4294901760, %v536_v56  ;;  %v550_v37 = vsub.f32 %v1876_v44, %v549_v45  ;;  %v570_v44 = vand.u32 4294901760, %v1921_v54 }
  0xb0   : > { %v398_v63 = vadd.f32 %v397_v29, %v395_v60  ;;  %v544_v24 = vand.u32 4294901760, %v543_v22  ;;  %v557_v29 = vsub.f32 %v1895_v48, %v556_v57  ;;  %v564_v60 = vsub.f32 %v1910_v51, %v563_v41 }
  0xb1   : > { %v551_v36 = vand.u32 4294901760, %v550_v37  ;;  %v577_v48 = vand.u32 4294901760, %v1936_v58  ;;  %v584_v51 = vand.u32 4294901760, %v1948_v61 }
  0xb2   : > { %v400_v3 = vrot.slane %v398_v63, 7  ;;  %v558_v63 = vand.u32 4294901760, %v557_v29 }
  0xb4   : > { %v403_v4 = vsel %vm402_vm5, %v392_v13, %v400_v3  ;;  %v571_v13 = vsub.f32 %v1921_v54, %v570_v44  ;;  %v565_v3 = vand.u32 4294901760, %v564_v60  ;;  %v591_v54 = vand.u32 4294901760, %v1960_v0 }
  0xb5   : > { %v2060_v25 = vand.u32 4294901760, %v403_v4 }
  0xb7   : > { %v2064_v21 = vsub.f32 %v403_v4, %v2060_v25  ;;  %v578_v4 = vsub.f32 %v1936_v58, %v577_v48  ;;  %v598_v58 = vand.u32 4294901760, %v1972_v5 }
  0xb9   : > { %1552 = vmatmul.mubr.f32.vlgmr.msra.gmra.mxu0 %v2064_v21  ;;  %v503_v14 = vand.u32 4294901760, %v2064_v21  ;;  %v579_v19 = vand.u32 4294901760, %v578_v4 }
  0xba   : > { %1590 = vmatpush3.msra.mxu0 %v514_v17  ;;  %1621 = vmatprep.mubr.msk.f32.mxu0 %vm1709_vm4, %v2290_v39  ;;  %v572_v17 = vand.u32 4294901760, %v571_v13 }
  0xbb   : > { %1591 = vmatprep.subr.mxu0 %v2290_v39  ;;  %v504_v18 = vsub.f32 %v2064_v21, %v503_v14  ;;  %v1695_v21 = vld [vmem:[%s2285_s4 + $0x4] ss:$8 sps:$4 sm:$0xff]  }
  0xbc   : > { %1592 = vmatpush3.msra.mxu0 %v521_v26  ;;  %v585_v26 = vsub.f32 %v1948_v61, %v584_v51  ;;  %v605_v61 = vand.u32 4294901760, %v1981_v7 }
  0xbd   : > { %1593 = vmatprep.subr.mxu0 %v2290_v39  ;;  %v505_v50 = vand.u32 4294901760, %v504_v18  ;;  %v599_v18 = vsub.f32 %v1972_v5, %v598_v58  ;;  %v619_v5 = vand.u32 4294901760, %v1997_v10 }
  0xbe   : > { %1594 = vmatpush3.msra.mxu0 %v528_v20  ;;  %v592_v20 = vsub.f32 %v1960_v0, %v591_v54  ;;  %v586_v33 = vand.u32 4294901760, %v585_v26  ;;  %v612_v0 = vand.u32 4294901760, %v1990_v9 }
  0xbf   : > { %1595 = vmatprep.subr.mxu0 %v2290_v39  ;;  %1482 = vmatmul.mubr.f32.vlgmr.msra.gmra.mxu1 %v505_v50  ;;  %v600_v47 = vand.u32 4294901760, %v599_v18 }
  0xc0   : > { %1485 = vmatpush3.msra.mxu1 %v516_v27  ;;  %1596 = vmatpush3.msra.mxu0 %v535_v16  ;;  %v593_v27 = vand.u32 4294901760, %v592_v20  ;;  %v606_v16 = vsub.f32 %v1981_v7, %v605_v61  ;;  %v613_v50 = vsub.f32 %v1990_v9, %v612_v0  ;;  %v620_v7 = vsub.f32 %v1997_v10, %v619_v5 }
  0xc1   : > { %1486 = vmatprep.subr.mxu1 %v2290_v39  ;;  %1597 = vmatprep.subr.mxu0 %v2290_v39 }
  0xc2   : > { %1487 = vmatpush3.msra.mxu1 %v523_v31  ;;  %1598 = vmatpush3.msra.mxu0 %v542_v53  ;;  %v607_v31 = vand.u32 4294901760, %v606_v16  ;;  %v614_v53 = vand.u32 4294901760, %v613_v50  ;;  %v621_v9 = vand.u32 4294901760, %v620_v7 }
  0xc3   : > { %1488 = vmatprep.subr.mxu1 %v2290_v39  ;;  %1599 = vmatprep.subr.mxu0 %v2290_v39 }
  0xc4   : > { %1489 = vmatpush3.msra.mxu1 %v530_v1  ;;  %1600 = vmatpush3.msra.mxu0 %v549_v45 }
  0xc5   : > { %1490 = vmatprep.subr.mxu1 %v2290_v39  ;;  %1601 = vmatprep.subr.mxu0 %v2290_v39 }
  0xc6   : > { %1491 = vmatpush3.msra.mxu1 %v537_v34  ;;  %1602 = vmatpush3.msra.mxu0 %v556_v57 }
  0xc7   : > { %1492 = vmatprep.subr.mxu1 %v2290_v39  ;;  %1603 = vmatprep.subr.mxu0 %v2290_v39 }
  0xc8   : > { %1493 = vmatpush3.msra.mxu1 %v544_v24  ;;  %1604 = vmatpush3.msra.mxu0 %v563_v41 }
  0xc9   : > { %1494 = vmatprep.subr.mxu1 %v2290_v39  ;;  %1605 = vmatprep.subr.mxu0 %v2290_v39 }
  0xca   : > { %1495 = vmatpush3.msra.mxu1 %v551_v36  ;;  %1606 = vmatpush3.msra.mxu0 %v570_v44 }
  0xcb   : > { %1496 = vmatprep.subr.mxu1 %v2290_v39  ;;  %1607 = vmatprep.subr.mxu0 %v2290_v39 }
  0xcc   : > { %1497 = vmatpush3.msra.mxu1 %v558_v63  ;;  %1608 = vmatpush3.msra.mxu0 %v577_v48 }
  0xcd   : > { %1498 = vmatprep.subr.mxu1 %v2290_v39  ;;  %1609 = vmatprep.subr.mxu0 %v2290_v39 }
  0xce   : > { %1499 = vmatpush3.msra.mxu1 %v565_v3  ;;  %1610 = vmatpush3.msra.mxu0 %v584_v51 }
  0xcf   : > { %1500 = vmatprep.subr.mxu1 %v2290_v39  ;;  %1611 = vmatprep.subr.mxu0 %v2290_v39 }
  0xd0   : > { %1501 = vmatpush3.msra.mxu1 %v572_v17  ;;  %1612 = vmatpush3.msra.mxu0 %v591_v54  ;;  %v373_v17 = vld [vmem:[%s2284_s3 + $0x1] sm:$0x1] }
  0xd1   : > { %1502 = vmatprep.subr.mxu1 %v2290_v39  ;;  %1613 = vmatprep.subr.mxu0 %v2290_v39  ;;  %v1071_v54 = vrot.slane %v373_v17, 7 }
  0xd2   : > { %1503 = vmatpush3.msra.mxu1 %v579_v19  ;;  %1614 = vmatpush3.msra.mxu0 %v598_v58 }
  0xd3   : > { %1504 = vmatprep.subr.mxu1 %v2290_v39  ;;  %1615 = vmatprep.subr.mxu0 %v2290_v39 }
  0xd4   : > { %1505 = vmatpush3.msra.mxu1 %v586_v33  ;;  %1616 = vmatpush3.msra.mxu0 %v605_v61  ;;  %v374_v33 = vld [vmem:[%s2284_s3 + $0x2] sm:$0x1] }
  0xd5   : > { %1506 = vmatprep.subr.mxu1 %v2290_v39  ;;  %1617 = vmatprep.subr.mxu0 %v2290_v39 }
  0xd6   : > { %1507 = vmatpush3.msra.mxu1 %v593_v27  ;;  %1618 = vmatpush3.msra.mxu0 %v612_v0 }
  0xd7   : > { %1508 = vmatprep.subr.mxu1 %v2290_v39  ;;  %1619 = vmatprep.subr.mxu0 %v2290_v39 }
  0xd8   : > { %1509 = vmatpush3.msra.mxu1 %v600_v47  ;;  %1620 = vmatpush3.msra.mxu0 %v619_v5 }
  0xd9   : > { %1510 = vmatprep.subr.mxu1 %v2290_v39  ;;  %1622 = vmatmul.mubr.f32.vlgmr.msra.gmra.mxu0 %v2060_v25 }
  0xda   : > { %1511 = vmatpush3.msra.mxu1 %v607_v31  ;;  %1516 = vmatprep.mubr.msk.f32.mxu1 %vm1709_vm4, %v2290_v39 }
  0xdb   : > { %1512 = vmatprep.subr.mxu1 %v2290_v39 }
  0xdc   : > { %1513 = vmatpush3.msra.mxu1 %v614_v53 }
  0xdd   : > { %1514 = vmatprep.subr.mxu1 %v2290_v39 }
  0xde   : > { %1515 = vmatpush3.msra.mxu1 %v621_v9 }
  0xdf   : > { %1517 = vmatmul.mubr.f32.vlgmr.msra.gmra.mxu1 %v2060_v25  ;;  %1554 = vmatprep.subr.mxu1 %v2290_v39 }
  0xe0   : > { %1555 = vmatpush3.msra.mxu1 %v1799_v23  ;;  %1586 = vmatprep.mubr.msk.f32.mxu1 %vm1709_vm4, %v2290_v39 }
  0xe1   : > { %1556 = vmatprep.subr.mxu1 %v2290_v39 }
  0xe2   : > { %1557 = vmatpush3.msra.mxu1 %v1814_v28 }
  0xe3   : > { %1558 = vmatprep.subr.mxu1 %v2290_v39 }
  0xe4   : > { %1559 = vmatpush3.msra.mxu1 %v1825_v32 }
  0xe5   : > { %1560 = vmatprep.subr.mxu1 %v2290_v39 }
  0xe6   : > { %1561 = vmatpush3.msra.mxu1 %v1839_v35 }
  0xe7   : > { %1562 = vmatprep.subr.mxu1 %v2290_v39 }
  0xe8   : > { %1563 = vmatpush3.msra.mxu1 %v1850_v38 }
  0xe9   : > { %1564 = vmatprep.subr.mxu1 %v2290_v39 }
  0xea   : > { %1565 = vmatpush3.msra.mxu1 %v1860_v40 }
  0xeb   : > { %1566 = vmatprep.subr.mxu1 %v2290_v39 }
  0xec   : > { %1567 = vmatpush3.msra.mxu1 %v1872_v43 }
  0xed   : > { %1568 = vmatprep.subr.mxu1 %v2290_v39 }
  0xee   : > { %1569 = vmatpush3.msra.mxu1 %v1886_v46 }
  0xef   : > { %1570 = vmatprep.subr.mxu1 %v2290_v39 }
  0xf0   : > { %1571 = vmatpush3.msra.mxu1 %v1898_v49 }
  0xf1   : > { %1572 = vmatprep.subr.mxu1 %v2290_v39 }
  0xf2   : > { %1573 = vmatpush3.msra.mxu1 %v1912_v52 }
  0xf3   : > { %1574 = vmatprep.subr.mxu1 %v2290_v39 }
  0xf4   : > { %1575 = vmatpush3.msra.mxu1 %v1924_v55 }
  0xf5   : > { %1576 = vmatprep.subr.mxu1 %v2290_v39 }
  0xf6   : > { %1577 = vmatpush3.msra.mxu1 %v1939_v59 }
  0xf7   : > { %1578 = vmatprep.subr.mxu1 %v2290_v39 }
  0xf8   : > { %1579 = vmatpush3.msra.mxu1 %v1951_v62 }
  0xf9   : > { %1580 = vmatprep.subr.mxu1 %v2290_v39 }
  0xfa   : > { %1581 = vmatpush3.msra.mxu1 %v1963_v2 }
  0xfb   : > { %1582 = vmatprep.subr.mxu1 %v2290_v39 }
  0xfc   : > { %1583 = vmatpush3.msra.mxu1 %v1975_v6 }
  0xfd   : > { %1584 = vmatprep.subr.mxu1 %v2290_v39 }
  0xfe   : > { %1585 = vmatpush3.msra.mxu1 %v1984_v8 }
  0xff   : > { %1587 = vmatmul.mubr.f32.vlgmr.msra.gmra.mxu1 %v503_v14  ;;  %1624 = vmatprep.subr.mxu1 %v2290_v39  ;;  %v1693_v14 = vld [vmem:[%s2285_s4] ss:$8 sps:$4 sm:$0xff]  }
 0x100   : > { %1625 = vmatpush3.msra.mxu1 %v1799_v23  ;;  %1656 = vmatprep.mubr.msk.f32.mxu1 %vm1709_vm4, %v2290_v39  ;;  %v1674_v23 = vld [vmem:[%s2285_s4 + $0x74] ss:$8 sps:$4 sm:$0xff]  }
 0x101   : > { %1626 = vmatprep.subr.mxu1 %v2290_v39  ;;  %1201 = vmatprep.subr.bf16.mxu0 %v1674_v23 }
 0x102   : > { %1627 = vmatpush3.msra.mxu1 %v1814_v28  ;;  %v1672_v28 = vld [vmem:[%s2285_s4 + $0x70] ss:$8 sps:$4 sm:$0xff]  }
 0x103   : > { %1628 = vmatprep.subr.mxu1 %v2290_v39  ;;  %1202 = vmatpush1.bf16.msra.mxu0 %v1672_v28 }
 0x104   : > { %1629 = vmatpush3.msra.mxu1 %v1825_v32  ;;  %v1677_v32 = vld [vmem:[%s2285_s4 + $0x64] ss:$8 sps:$4 sm:$0xff]  }
 0x105   : > { %1630 = vmatprep.subr.mxu1 %v2290_v39  ;;  %1203 = vmatprep.subr.bf16.mxu0 %v1677_v32 }
 0x106   : > { %1631 = vmatpush3.msra.mxu1 %v1839_v35  ;;  %v1675_v35 = vld [vmem:[%s2285_s4 + $0x60] ss:$8 sps:$4 sm:$0xff]  }
 0x107   : > { %1632 = vmatprep.subr.mxu1 %v2290_v39  ;;  %1204 = vmatpush1.bf16.msra.mxu0 %v1675_v35 }
 0x108   : > { %1633 = vmatpush3.msra.mxu1 %v1850_v38  ;;  %v1680_v38 = vld [vmem:[%s2285_s4 + $0x54] ss:$8 sps:$4 sm:$0xff]  }
 0x109   : > { %1634 = vmatprep.subr.mxu1 %v2290_v39  ;;  %1205 = vmatprep.subr.bf16.mxu0 %v1680_v38 }
 0x10a   : > { %1635 = vmatpush3.msra.mxu1 %v1860_v40  ;;  %v1678_v40 = vld [vmem:[%s2285_s4 + $0x50] ss:$8 sps:$4 sm:$0xff]  }
 0x10b   : > { %1636 = vmatprep.subr.mxu1 %v2290_v39  ;;  %1206 = vmatpush1.bf16.msra.mxu0 %v1678_v40 }
 0x10c   : > { %1637 = vmatpush3.msra.mxu1 %v1872_v43  ;;  %v1683_v43 = vld [vmem:[%s2285_s4 + $0x44] ss:$8 sps:$4 sm:$0xff]  }
 0x10d   : > { %1638 = vmatprep.subr.mxu1 %v2290_v39  ;;  %1207 = vmatprep.subr.bf16.mxu0 %v1683_v43 }
 0x10e   : > { %1639 = vmatpush3.msra.mxu1 %v1886_v46  ;;  %v1681_v46 = vld [vmem:[%s2285_s4 + $0x40] ss:$8 sps:$4 sm:$0xff]  }
 0x10f   : > { %1640 = vmatprep.subr.mxu1 %v2290_v39  ;;  %1208 = vmatpush1.bf16.msra.mxu0 %v1681_v46 }
 0x110   : > { %1641 = vmatpush3.msra.mxu1 %v1898_v49  ;;  %v1686_v49 = vld [vmem:[%s2285_s4 + $0x34] ss:$8 sps:$4 sm:$0xff]  }
 0x111   : > { %1642 = vmatprep.subr.mxu1 %v2290_v39  ;;  %1209 = vmatprep.subr.bf16.mxu0 %v1686_v49 }
 0x112   : > { %1643 = vmatpush3.msra.mxu1 %v1912_v52 }
 0x113   : > { %1644 = vmatprep.subr.mxu1 %v2290_v39 }
 0x114   : > { %1645 = vmatpush3.msra.mxu1 %v1924_v55  ;;  %v1684_v55 = vld [vmem:[%s2285_s4 + $0x30] ss:$8 sps:$4 sm:$0xff]  }
 0x115   : > { %1646 = vmatprep.subr.mxu1 %v2290_v39  ;;  %1210 = vmatpush1.bf16.msra.mxu0 %v1684_v55 }
 0x116   : > { %1647 = vmatpush3.msra.mxu1 %v1939_v59 }
 0x117   : > { %1648 = vmatprep.subr.mxu1 %v2290_v39 }
 0x118   : > { %1649 = vmatpush3.msra.mxu1 %v1951_v62  ;;  %v1689_v62 = vld [vmem:[%s2285_s4 + $0x24] ss:$8 sps:$4 sm:$0xff]  }
 0x119   : > { %1650 = vmatprep.subr.mxu1 %v2290_v39  ;;  %1211 = vmatprep.subr.bf16.mxu0 %v1689_v62 }
 0x11a   : > { %1651 = vmatpush3.msra.mxu1 %v1963_v2  ;;  %v1687_v2 = vld [vmem:[%s2285_s4 + $0x20] ss:$8 sps:$4 sm:$0xff]  }
 0x11b   : > { %1652 = vmatprep.subr.mxu1 %v2290_v39  ;;  %1212 = vmatpush1.bf16.msra.mxu0 %v1687_v2 }
 0x11c   : > { %1653 = vmatpush3.msra.mxu1 %v1975_v6 }
 0x11d   : > { %1654 = vmatprep.subr.mxu1 %v2290_v39  ;;  %v1710_v39 = vmov 0  }
 0x11e   : > { %1655 = vmatpush3.msra.mxu1 %v1984_v8  ;;  %v1692_v8 = vld [vmem:[%s2285_s4 + $0x14] ss:$8 sps:$4 sm:$0xff]   ;;  %1233 = vmatprep.mubr.bf16.mxu0 %v1710_v39 }
 0x11f   : > { %1657 = vmatmul.mubr.f32.vlgmr.msra.gmra.mxu1 %v2060_v25  ;;  %v1690_v25 = vld [vmem:[%s2285_s4 + $0x10] ss:$8 sps:$4 sm:$0xff]   ;;  %1213 = vmatprep.subr.bf16.mxu0 %v1692_v8 }
 0x120   : > { %1214 = vmatpush1.bf16.msra.mxu0 %v1690_v25 }
 0x121   : > { %1215 = vmatprep.subr.bf16.mxu0 %v1695_v21 }
 0x124   : > { %1216 = vmatpush1.bf16.msra.mxu0 %v1693_v14 }
 0x179   : > { %v762_v52 = vpop.f32.mrf.mxu0 }
 0x17b   : > { %v1553_v59 = vpop.f32.mrf.mxu0 }
 0x17f   : > { %v507_v6 = vpop.f32.mrf.mxu1 }
 0x181   : > { %v1483_v10 = vpop.f32.mrf.mxu1 }
 0x199   : > { %v970_v56 = vpop.f32.mrf.mxu0 }
 0x19b   : > { %v1623_v1 = vpop.f32.mrf.mxu0 }
 0x19f   : > { %v658_v45 = vpop.f32.mrf.mxu1 }
 0x1a0   : > { %v659_v22 = vadd.f32 %v658_v45, %v507_v6 }
 0x1a1   : > { %v1518_v34 = vpop.f32.mrf.mxu1 }
 0x1a2   : > { %v763_v57 = vadd.f32 %v762_v52, %v659_v22 }
 0x1bf   : > { %v851_v37 = vpop.f32.mrf.mxu1 }
 0x1c0   : > { %v852_v24 = vadd.f32 %v851_v37, %v763_v57 }
 0x1c1   : > { %v1588_v41 = vpop.f32.mrf.mxu1 }
 0x1c2   : > { %v971_v29 = vadd.f32 %v970_v56, %v852_v24 }
 0x1df   : > { %v1057_v36 = vpop.f32.mrf.mxu1 }
 0x1e0   : > { %v1058_v44 = vadd.f32 %v1057_v36, %v971_v29 }
 0x1e1   : > { %v1658_v60 = vpop.f32.mrf.mxu1 }
 0x1e2   : > { %v1061_v63 = vmul.f32 0.001953125, %v1058_v44 }
 0x1e4   : > { %v1062_v48 = vmul.f32 %v1061_v63, %v1061_v63  ;;  %v1074_v58 = vsub.f32 %v2054_v42, %v1061_v63  ;;  %v1109_v42 = vld [vmem:[%s2286_s5] sm:$0x3] }
 0x1e5   : > { %v1114_v7 = vrot.slane %v1109_v42, %v2018_v12  ;;  %v1118_v53 = vrot.slane %v1109_v42, %v2015_v11 }
 0x1e6   : > { %v1064_v13 = vrot.slane %v1062_v48, 7 }
 0x1e8   : > { %v1066_v3 = vsub.f32 %v1061_v63, %v1064_v13 }
 0x1ea   : > { %v1067_v51 = vmax.f32 %v1066_v3, 0.0 }
 0x1ec   : > { %v1068_v4 = vadd.f32 1e-05, %v1067_v51 }
 0x1ee   : > { %1696 = vrsqrt.f32 %v1068_v4 }
 0x1fb   : > { %v1697_v26 = vpop.eup %1696 }
 0x1fc   : > { %v1073_v19 = vmul.f32 %v1697_v26, %v1071_v54 }
 0x1fe   : > { %v1076_v20 = vrot.slane %v1073_v19, 1  ;;  %v1083_v18 = vrot.slane %v1073_v19, %v2015_v11 }
 0x200   : > { %v1078_v61 = vmul.f32 %v1076_v20, %v1074_v58  ;;  %v1084_v0 = vmul.f32 %v1083_v18, %v2043_v30  ;;  %v1085_v16 = vmul.f32 %v1083_v18, %v2041_v15 }
 0x202   : > { %v1079_v27 = vadd.f32 %v1078_v61, %v374_v33 }
 0x204   : > { %v1089_v47 = vrot.slane %v1079_v27, %v2018_v12 }
 0x206   : > { %v1090_v5 = vadd.f32 %v1089_v47, %v1084_v0  ;;  %v1091_v50 = vadd.f32 %v1089_v47, %v1085_v16 }
 0x208   : > { %v1092_v31 = vpack.c.bf16 %v1091_v50, %v1090_v5 }
 0x20a   : > { %1234 = vmatmul.mubr.bf16.vlgmr.msra.gmra.mxu0 %v1092_v31 }
 0x2ca   : > { %v1235_v9 = vpop.f32.mrf.mxu0 }
 0x2cb   : > { %v1236_v28 = vadd.f32 %v1235_v9, %v1114_v7 }
 0x2cc   : > { %v1237_v23 = vpop.f32.mrf.mxu0 }
 0x2cd   : > { %v1238_v30 = vadd.f32 %v1237_v23, %v1118_v53 }
 0x2ce   : > { %v1239_v15 = vpop.f32.mrf.mxu0 }
 0x2cf   : > { %v1345_v32 = vpack.c.bf16 %v1238_v30, %v1236_v28  ;;  %v1240_v38 = vadd.f32 %v1239_v15, %v1114_v7 }
 0x2d0   : > { %v1241_v35 = vpop.f32.mrf.mxu0 }
 0x2d1   : > { %1256 = vst [vmem:[%s251_s20] sm:$0xff] %v1345_v32  ;;  %v1242_v40 = vadd.f32 %v1241_v35, %v1118_v53 }
 0x2d3   : > { %v1346_v43 = vpack.c.bf16 %v1242_v40, %v1240_v38 }
 0x2d5   : > { %1257 = vst [vmem:[%s251_s20 + $0x8] sm:$0xff] %v1346_v43 }
 0x2d6 PF: > { %s16_s21 = sadd.s32 1, %s1704_s21  }
 0x2d7   : > { %p13_p4 = scmp.ge.s32.totalorder %s16_s21, 4  }
 0x2d9   :  { %15 = sbr.rel (!%p13_p4) target bundleno = 1 (0x1), region = 74 }

</bundles_post_ra>
